<compile_context>
chip_gen: v5e
topology: v5e:2x2
jax: 0.10.0
libtpu: 0.0.40
codegen_flags: <defaults>
</compile_context>

<pallas_src>
import jax
import jax.numpy as jnp
from jax.experimental import pallas as pl
from jax.experimental.pallas import tpu as pltpu


# ----------------------------------------------------------------------------
# Feature / hardware detection
# ----------------------------------------------------------------------------
def _supports_buffered():
    if not hasattr(pl, "Buffered"):
        return False
    try:
        pl.BlockSpec((8, 128), lambda i: (i, 0), pipeline_mode=pl.Buffered(1))
        return True
    except Exception:
        return False


_HAS_BUFFERED = _supports_buffered()


def _tpu_generation():
    try:
        kind = jax.devices()[0].device_kind.lower()
    except Exception:
        return 6
    for g in (7, 6, 5, 4):
        if str(g) in kind:
            return g
    return 6


def _vmem_capacity_bytes():
    try:
        cap = int(getattr(pltpu.get_tpu_info(), "vmem_capacity_bytes", 0))
        return cap if cap > 0 else None
    except Exception:
        return None


def _gen_budget(gen):
    """(tile-selection budget, scoped vmem_limit) in bytes, clamped by physical VMEM."""
    if gen >= 7:          # 64 MiB physical per TensorCore on v7x
        budget, limit = 36 << 20, 48 << 20
    elif gen == 6:        # 128 MiB physical
        budget, limit = 88 << 20, 104 << 20
    else:                 # v5e and older: 128 MiB physical, conservative scoped request
        budget, limit = 28 << 20, 64 << 20
    cap = _vmem_capacity_bytes()
    if cap:
        limit = max(16 << 20, min(limit, cap - (8 << 20)))
        budget = max(8 << 20, min(budget, limit - (6 << 20)))
    return budget, limit


# ----------------------------------------------------------------------------
# Kernels
# ----------------------------------------------------------------------------
def _kv_proj_kernel_resident_k(h_ref, s_ref, wo_ref, ws_ref, b_ref, o_ref):
    """Full-K tile: o = bf16(h @ Wo + bias) + bf16(s @ Ws).  (tk == K, no scratch.)"""
    orig = jnp.dot(h_ref[...], wo_ref[...], preferred_element_type=jnp.float32)
    orig = orig + b_ref[...].astype(jnp.float32)            # bias broadcast over rows
    safe = jnp.dot(s_ref[...], ws_ref[...], preferred_element_type=jnp.float32)
    # Per-branch bf16 rounding before the add matches the PyTorch module exactly.
    o_ref[...] = orig.astype(o_ref.dtype) + safe.astype(o_ref.dtype)


def _kv_proj_kernel_acc(h_ref, s_ref, wo_ref, ws_ref, b_ref, o_ref, acc_o, acc_s):
    """K-tiled path: per-branch f32 accumulators, bias folded into acc init, per-branch
    bf16 rounding at the last K step (matches PyTorch bf16 Linear -> bf16 add)."""
    k = pl.program_id(2)

    @pl.when(k == 0)
    def _():
        # Fold the bias into the original-branch accumulator: removes one (tm, tn) f32
        # add + broadcast from the epilogue.
        acc_o[...] = jnp.broadcast_to(b_ref[...].astype(jnp.float32), acc_o.shape)
        acc_s[...] = jnp.zeros_like(acc_s)

    acc_o[...] += jnp.dot(h_ref[...], wo_ref[...], preferred_element_type=jnp.float32)
    acc_s[...] += jnp.dot(s_ref[...], ws_ref[...], preferred_element_type=jnp.float32)

    @pl.when(k == pl.num_programs(2) - 1)
    def _():
        o_ref[...] = acc_o[...].astype(o_ref.dtype) + acc_s[...].astype(o_ref.dtype)


# ----------------------------------------------------------------------------
# VMEM accounting & tile selection
# ----------------------------------------------------------------------------
def _vmem_bytes(tm, tn, tk, num_k, single_buffer_w):
    bpe = 2                                          # bf16
    acts = 2 * 2 * tm * tk * bpe                     # h + s, double-buffered
    wbuf = 1 if single_buffer_w else 2               # grid-invariant weights: 1 buffer
    wgts = 2 * wbuf * tk * tn * bpe                  # Wo + Ws
    bias = wbuf * max(tn, 128) * bpe
    outb = 2 * tm * tn * bpe                         # output, double-buffered
    accs = (2 * tm * tn * 4) if num_k > 1 else 0     # per-branch f32 accumulators
    epil = 2 * tm * tn * 4                           # f32 MXU results / epilogue temps
    return acts + wgts + bias + outb + accs + epil


def _select_tiles(M, N, K):
    gen = _tpu_generation()
    budget, vmem_limit = _gen_budget(gen)
    pref = 256 if gen >= 6 else 128    # v6e/v7x MXUs are 2x256x256; v5e's are 4x128x128

    def _divisor_cands(dim, sizes):
        prim = [c for c in sizes if c <= dim and dim % c == 0 and c % pref == 0]
        back = [c for c in sizes if c <= dim and dim % c == 0 and c % pref != 0]
        return prim + back

    # tn: prefer full N (activations fetched once per row tile; weights j-invariant),
    # then large pref-aligned tiles; 128 only as a last resort.
    tn_cands = ([N] if N <= 4096 else []) + _divisor_cands(N, (4096, 2048, 1024, 512, 256, 128))
    tn_cands = list(dict.fromkeys(tn_cands)) or [N]

    # tk: prefer the whole reduction resident (scratch-free kernel), then >=256 tiles.
    tk_cands = [K] + _divisor_cands(K, (4096, 2048, 1024, 512, 256)) + _divisor_cands(K, (128,))
    tk_cands = list(dict.fromkeys(tk_cands))

    tm_cands = ([M] if M <= 1024 else []) + \
        [c for c in (1024, 512, 256, 128, 64, 32, 16) if c <= M and M % c == 0]
    tm_cands = list(dict.fromkeys(tm_cands)) or [M]

    def _fits(tm, tn, tk):
        nk, nn = K // tk, N // tn
        single_w = _HAS_BUFFERED and nk == 1 and nn == 1
        return _vmem_bytes(tm, tn, tk, nk, single_w) <= budget

    def _cost(tm, tn, tk):
        # Approximate HBM traffic + per-step overhead (~0.35us/step ~ 0.5 MB equivalent).
        nm, nn, nk = M // tm, N // tn, K // tk
        steps = nm * nn * nk
        act_fetch = nm if nk == 1 else steps              # h/s block index is j-invariant
        wgt_fetch = 1 if (nk == 1 and nn == 1) else steps  # invariant weights DMA'd once
        act_bytes = 2 * act_fetch * tm * tk * 2
        wgt_bytes = 2 * wgt_fetch * tk * tn * 2
        out_bytes = M * N * 2
        return act_bytes + wgt_bytes + out_bytes + steps * 500_000

    combos = [(tm, tn, tk) for tm in tm_cands for tn in tn_cands for tk in tk_cands]
    feasible = [c for c in combos if _fits(*c)]
    if feasible:
        tm, tn, tk = min(feasible, key=lambda c: _cost(*c))
    else:
        # Nothing fits the budget: take the smallest footprint; the explicit
        # vmem_limit_bytes absorbs the overshoot.
        tm, tn, tk = min(combos, key=lambda c: _vmem_bytes(c[0], c[1], c[2], K // c[2], False))

    # Never emit a single-step grid: split K into >=4 tiles (or N, or M) so the
    # BlockSpec pipeline can overlap the weight DMA with MXU compute.
    if (M // tm) * (N // tn) * (K // tk) == 1:
        for min_split in (4, 2):
            new_tk = next((c for c in tk_cands
                           if c < K and K // c >= min_split and _fits(tm, tn, c)), None)
            if new_tk is not None:
                tk = new_tk
                break
        else:
            if N % 2 == 0 and (N // 2) % 128 == 0 and _fits(tm, N // 2, tk):
                tn = N // 2
            else:
                new_tm = next((c for c in tm_cands if c < tm and _fits(c, tn, tk)), None)
                if new_tm is not None:
                    tm = new_tm

    # v7x has 2 TensorCores: guarantee >= 2 "parallel" grid iterations to shard over.
    if gen >= 7 and (M // tm) * (N // tn) == 1:
        if N % 2 == 0 and (N // 2) % 128 == 0 and _fits(tm, N // 2, tk):
            tn = N // 2
        else:
            new_tm = next((c for c in tm_cands if c < tm and _fits(c, tn, tk)), None)
            if new_tm is not None:
                tm = new_tm

    # Alignment sanity (lane = 128 or full extent, bf16 sublane pack = 16 or full extent).
    assert tn == N or tn % 128 == 0
    assert tk == K or tk % 128 == 0
    assert tm == M or tm % 16 == 0
    return tm, tn, tk, vmem_limit


# ----------------------------------------------------------------------------
# pallas_call builder + public wrapper
# ----------------------------------------------------------------------------
def _kv_proj_pallas(h2, s2, w_orig_t, w_safe_t, b2, *, tm, tn, tk, vmem_limit):
    M, K = h2.shape
    N = w_orig_t.shape[1]
    assert M % tm == 0 and N % tn == 0 and K % tk == 0
    num_m, num_n, num_k = M // tm, N // tn, K // tk

    # Grid-invariant weight/bias blocks are DMA'd once by Pallas but double-buffered by
    # default; single-buffer them (Buffered(1)) so the freed VMEM buys larger tiles.
    invariant_w = _HAS_BUFFERED and num_k == 1 and num_n == 1
    w_kwargs = dict(pipeline_mode=pl.Buffered(1)) if invariant_w else {}

    in_specs = [
        pl.BlockSpec((tm, tk), lambda i, j, k: (i, k)),               # hidden_states rows
        pl.BlockSpec((tm, tk), lambda i, j, k: (i, k)),               # safe_hidden_states rows
        pl.BlockSpec((tk, tn), lambda i, j, k: (k, j), **w_kwargs),   # original weight [K, N]
        pl.BlockSpec((tk, tn), lambda i, j, k: (k, j), **w_kwargs),   # safe weight [K, N]
        pl.BlockSpec((1, tn), lambda i, j, k: (0, j), **w_kwargs),    # original bias
    ]
    out_spec = pl.BlockSpec((tm, tn), lambda i, j, k: (i, j))

    if num_k == 1:
        kernel = _kv_proj_kernel_resident_k
        scratch = []
    else:
        kernel = _kv_proj_kernel_acc
        scratch = [pltpu.VMEM((tm, tn), jnp.float32),
                   pltpu.VMEM((tm, tn), jnp.float32)]

    return pl.pallas_call(
        kernel,
        out_shape=jax.ShapeDtypeStruct((M, N), jnp.bfloat16),
        grid_spec=pltpu.PrefetchScalarGridSpec(
            num_scalar_prefetch=0,
            grid=(num_m, num_n, num_k),
            in_specs=in_specs,
            out_specs=out_spec,
            scratch_shapes=scratch,
        ),
        compiler_params=pltpu.CompilerParams(
            dimension_semantics=("parallel", "parallel", "arbitrary"),
            vmem_limit_bytes=vmem_limit),
    )(h2, s2, w_orig_t, w_safe_t, b2)


@jax.jit
def safe_ft_kv_proj(hidden_states, safe_hidden_states, w_orig_t, b_orig, w_safe_t):
    """SafeFTforKV_proj.forward.

    hidden_states, safe_hidden_states : [B, S, K]  bf16
    w_orig_t, w_safe_t                : [K, N]     bf16  (pre-transposed, i.e. weight.T)
    b_orig                            : [N]        bf16
    returns                           : [B, S, N]  bf16
    """
    B, S, K = hidden_states.shape
    N = w_orig_t.shape[1]
    M = B * S

    h2 = hidden_states.reshape(M, K)
    s2 = safe_hidden_states.reshape(M, K)
    b2 = b_orig.reshape(1, N)

    tm, tn, tk, vmem_limit = _select_tiles(M, N, K)
    out2 = _kv_proj_pallas(h2, s2, w_orig_t, w_safe_t, b2,
                           tm=tm, tn=tn, tk=tk, vmem_limit=vmem_limit)
    return out2.reshape(B, S, N)


# ----------------------------------------------------------------------------
# Reference & self-test
# ----------------------------------------------------------------------------
def _reference(hidden_states, safe_hidden_states, w_orig_t, b_orig, w_safe_t):
    orig = (jnp.dot(hidden_states.astype(jnp.float32), w_orig_t.astype(jnp.float32))
            + b_orig.astype(jnp.float32)).astype(jnp.bfloat16)
    safe = jnp.dot(safe_hidden_states.astype(jnp.float32),
                   w_safe_t.astype(jnp.float32)).astype(jnp.bfloat16)
    return orig + safe


if __name__ == "__main__":
    # TODO(synk): the PyTorch module only prints a warning (and returns an undefined
    # variable) when the two branch shapes differ; this kernel implements the normal
    # equal-shape forward path.

    # --- test 1: small shapes consistent with the module (Linear(32 -> 64)) ----------
    B, S, K, N = 2, 8, 32, 64
    key = jax.random.PRNGKey(0)
    k_h, k_s, k_wo, k_bo, k_ws = jax.random.split(key, 5)

    hidden_states = jax.random.normal(k_h, (B, S, K), dtype=jnp.float32).astype(jnp.bfloat16)
    safe_hidden_states = jax.random.normal(k_s, (B, S, K), dtype=jnp.float32).astype(jnp.bfloat16)
    w_orig = (jax.random.normal(k_wo, (N, K), dtype=jnp.float32) * 0.05).astype(jnp.bfloat16)
    b_orig = (jax.random.normal(k_bo, (N,), dtype=jnp.float32) * 0.05).astype(jnp.bfloat16)
    w_safe = (jax.random.normal(k_ws, (N, K), dtype=jnp.float32) * 0.05).astype(jnp.bfloat16)

    # Transpose ONCE at "parameter load" time (outside the jitted hot path).
    w_orig_t = jnp.asarray(w_orig.T)   # [K, N]
    w_safe_t = jnp.asarray(w_safe.T)   # [K, N]

    out = safe_ft_kv_proj(hidden_states, safe_hidden_states, w_orig_t, b_orig, w_safe_t)
    out = jax.block_until_ready(out)
    ref = _reference(hidden_states, safe_hidden_states, w_orig_t, b_orig, w_safe_t)
    assert out.shape == (B, S, N) and out.dtype == jnp.bfloat16
    err = jnp.max(jnp.abs(out.astype(jnp.float32) - ref.astype(jnp.float32)))
    assert float(err) < 1e-1, f"max abs err {err}"

    # --- test 2: exercise the K-tiled accumulator path with forced small tiles -------
    M2, K2, N2 = 64, 256, 128
    k2 = jax.random.split(jax.random.PRNGKey(1), 5)
    h2 = jax.random.normal(k2[0], (M2, K2), dtype=jnp.float32).astype(jnp.bfloat16)
    s2 = jax.random.normal(k2[1], (M2, K2), dtype=jnp.float32).astype(jnp.bfloat16)
    wo2 = (jax.random.normal(k2[2], (K2, N2), dtype=jnp.float32) * 0.05).astype(jnp.bfloat16)
    ws2 = (jax.random.normal(k2[3], (K2, N2), dtype=jnp.float32) * 0.05).astype(jnp.bfloat16)
    bo2 = (jax.random.normal(k2[4], (N2,), dtype=jnp.float32) * 0.05).astype(jnp.bfloat16)

    out2 = _kv_proj_pallas(h2, s2, wo2, ws2, bo2.reshape(1, N2),
                           tm=64, tn=128, tk=128, vmem_limit=32 << 20)
    out2 = jax.block_until_ready(out2)
    ref2 = _reference(h2, s2, wo2, bo2, ws2)
    err2 = jnp.max(jnp.abs(out2.astype(jnp.float32) - ref2.astype(jnp.float32)))
    assert float(err2) < 1e-1, f"max abs err (acc path) {err2}"

    # --- test 3: moderate shape through the automatic tile selector ------------------
    # (exercises the single-step-grid splitting and, on v7x, the 2-TensorCore split)
    B3, S3, K3, N3 = 2, 128, 512, 256
    k3 = jax.random.split(jax.random.PRNGKey(2), 5)
    h3 = jax.random.normal(k3[0], (B3, S3, K3), dtype=jnp.float32).astype(jnp.bfloat16)
    s3 = jax.random.normal(k3[1], (B3, S3, K3), dtype=jnp.float32).astype(jnp.bfloat16)
    wo3 = (jax.random.normal(k3[2], (N3, K3), dtype=jnp.float32) * 0.05).astype(jnp.bfloat16)
    bo3 = (jax.random.normal(k3[3], (N3,), dtype=jnp.float32) * 0.05).astype(jnp.bfloat16)
    ws3 = (jax.random.normal(k3[4], (N3, K3), dtype=jnp.float32) * 0.05).astype(jnp.bfloat16)
    wo3_t = jnp.asarray(wo3.T)
    ws3_t = jnp.asarray(ws3.T)

    out3 = safe_ft_kv_proj(h3, s3, wo3_t, bo3, ws3_t)
    out3 = jax.block_until_ready(out3)
    ref3 = _reference(h3, s3, wo3_t, bo3, ws3_t)
    err3 = jnp.max(jnp.abs(out3.astype(jnp.float32) - ref3.astype(jnp.float32)))
    assert float(err3) < 1e-1, f"max abs err (auto-tiled path) {err3}"

    print("KERNEL_OK")
</pallas_src>

<mosaic_0001>
module attributes {stable_mosaic.version = 11 : i64} {
  func.func @_kv_proj_kernel_resident_k(%arg0: i32, %arg1: i32, %arg2: i32, %arg3: memref<16x32xbf16, #tpu.memory_space<vmem>>, %arg4: memref<16x32xbf16, #tpu.memory_space<vmem>>, %arg5: memref<32x64xbf16, #tpu.memory_space<vmem>>, %arg6: memref<32x64xbf16, #tpu.memory_space<vmem>>, %arg7: memref<1x64xbf16, #tpu.memory_space<vmem>>, %arg8: memref<16x64xbf16, #tpu.memory_space<vmem>>) attributes {dimension_semantics = [#tpu.dimension_semantics<parallel>, #tpu.dimension_semantics<parallel>, #tpu.dimension_semantics<arbitrary>], iteration_bounds = array<i64: 1, 1, 1>, scalar_prefetch = 0 : i64, scratch_operands = 0 : i64, tpu.core_type = #tpu.core_type<tc>, window_params = [{transform_indices = @transform_0, window_bounds = array<i64: 16, 32>}, {transform_indices = @transform_1, window_bounds = array<i64: 16, 32>}, {pipeline_mode = #tpu.pipeline_mode<synchronous>, transform_indices = @transform_2, window_bounds = array<i64: 32, 64>}, {pipeline_mode = #tpu.pipeline_mode<synchronous>, transform_indices = @transform_3, window_bounds = array<i64: 32, 64>}, {pipeline_mode = #tpu.pipeline_mode<synchronous>, transform_indices = @transform_4, window_bounds = array<i64: 1, 64>}, {transform_indices = @transform_5, window_bounds = array<i64: 16, 64>}]} {
    %c0 = arith.constant 0 : index
    %c0_0 = arith.constant 0 : index
    %0 = vector.load %arg3[%c0, %c0_0] : memref<16x32xbf16, #tpu.memory_space<vmem>>, vector<16x32xbf16>
    %c0_1 = arith.constant 0 : index
    %c0_2 = arith.constant 0 : index
    %1 = vector.load %arg5[%c0_1, %c0_2] : memref<32x64xbf16, #tpu.memory_space<vmem>>, vector<32x64xbf16>
    %cst = arith.constant dense<0.000000e+00> : vector<16x64xf32>
    %2 = tpu.matmul %0, %1, %cst {dimension_numbers = #tpu.dot_dimension_numbers<[1], [0], [0], [1], [0, 0, 1, 1], [], []>} : vector<16x32xbf16>, vector<32x64xbf16>, vector<16x64xf32> -> vector<16x64xf32>
    %c0_3 = arith.constant 0 : index
    %c0_4 = arith.constant 0 : index
    %3 = vector.load %arg7[%c0_3, %c0_4] : memref<1x64xbf16, #tpu.memory_space<vmem>>, vector<1x64xbf16>
    %4 = arith.extf %3 : vector<1x64xbf16> to vector<1x64xf32>
    %5 = vector.broadcast %4 : vector<1x64xf32> to vector<16x64xf32>
    %6 = arith.addf %2, %5 : vector<16x64xf32>
    %c0_5 = arith.constant 0 : index
    %c0_6 = arith.constant 0 : index
    %7 = vector.load %arg4[%c0_5, %c0_6] : memref<16x32xbf16, #tpu.memory_space<vmem>>, vector<16x32xbf16>
    %c0_7 = arith.constant 0 : index
    %c0_8 = arith.constant 0 : index
    %8 = vector.load %arg6[%c0_7, %c0_8] : memref<32x64xbf16, #tpu.memory_space<vmem>>, vector<32x64xbf16>
    %cst_9 = arith.constant dense<0.000000e+00> : vector<16x64xf32>
    %9 = tpu.matmul %7, %8, %cst_9 {dimension_numbers = #tpu.dot_dimension_numbers<[1], [0], [0], [1], [0, 0, 1, 1], [], []>} : vector<16x32xbf16>, vector<32x64xbf16>, vector<16x64xf32> -> vector<16x64xf32>
    %10 = arith.truncf %6 : vector<16x64xf32> to vector<16x64xbf16>
    %11 = arith.truncf %9 : vector<16x64xf32> to vector<16x64xbf16>
    %12 = arith.addf %10, %11 : vector<16x64xbf16>
    %c0_10 = arith.constant 0 : index
    %c0_11 = arith.constant 0 : index
    %13 = vector.load %arg8[%c0_10, %c0_11] : memref<16x64xbf16, #tpu.memory_space<vmem>>, vector<16x64xbf16>
    tpu.vector_store %arg8[%c0_10, %c0_11], %12 {strides = array<i32>} : memref<16x64xbf16, #tpu.memory_space<vmem>>, vector<16x64xbf16>,
    return
  }
  func.func @transform_0(%arg0: i32, %arg1: i32, %arg2: i32) -> (i32, i32) {
    %c0_i32 = arith.constant 0 : i32
    return %arg0, %arg2 : i32, i32
  }
  func.func @transform_1(%arg0: i32, %arg1: i32, %arg2: i32) -> (i32, i32) {
    %c0_i32 = arith.constant 0 : i32
    return %arg0, %arg2 : i32, i32
  }
  func.func @transform_2(%arg0: i32, %arg1: i32, %arg2: i32) -> (i32, i32) {
    %c0_i32 = arith.constant 0 : i32
    return %arg2, %arg1 : i32, i32
  }
  func.func @transform_3(%arg0: i32, %arg1: i32, %arg2: i32) -> (i32, i32) {
    %c0_i32 = arith.constant 0 : i32
    return %arg2, %arg1 : i32, i32
  }
  func.func @transform_4(%arg0: i32, %arg1: i32, %arg2: i32) -> (i32, i32) {
    %c0_i32 = arith.constant 0 : i32
    %c0_i32_0 = arith.constant 0 : i32
    return %c0_i32, %arg1 : i32, i32
  }
  func.func @transform_5(%arg0: i32, %arg1: i32, %arg2: i32) -> (i32, i32) {
    %c0_i32 = arith.constant 0 : i32
    return %arg0, %arg1 : i32, i32
  }
}

</mosaic_0001>

<bundles_post_ra>
// kernel: safe_ft_kv_proj.1
= control target key start
LH: loop header
LB: loop body
LE: loop exit
PB: predicated region body
PF: predicated region fallthrough
CT: control target
= control target key end

     0   :  { %10 = vsyncpa [#allocation3], 0  ;;  %s442_s0 = inlined_call_operand.hbm [shape: bf16[16,32], index: 0, kind: input, shape index: {}]   ;;  %s443_s1 = inlined_call_operand.hbm [shape: bf16[16,32], index: 1, kind: input, shape index: {}]   ;;  %s444_s2 = inlined_call_operand.hbm [shape: bf16[32,64], index: 2, kind: input, shape index: {}]   ;;  %s445_s3 = inlined_call_operand.hbm [shape: bf16[32,64], index: 3, kind: input, shape index: {}]   ;;  %s446_s4 = inlined_call_operand.vmem [shape: bf16[1,64], index: 4, kind: input, shape index: {}]   ;;  %s447_s5 = inlined_call_operand.hbm [shape: bf16[16,64], index: 5, kind: output, shape index: {}]  }
   0x1   :  { %11 = vsyncpa [#allocation6], 0 }
   0x2   :  { %12 = vsyncpa [#allocation9], 0 }
   0x3   :  { %13 = vsyncpa [#allocation4], 0  ;;  %s31_s20 = sshll.u32 %s443_s1, 4  ;;  %s372_s21 = smov [#allocation5]   ;;  %s32_s20 = int_to_ptr.hbm [resolvable:$true] %s31_s20 }
   0x4   :  { %s33_s22 = sshll.u32 %s372_s21, 4  ;;  %s18_s25 = sshll.u32 %s442_s0, 4  ;;  %s34_s22 = int_to_ptr.vmem [resolvable:$true] %s33_s22  ;;  %s19_s25 = int_to_ptr.hbm [resolvable:$true] %s18_s25 }
   0x5   :  { %s373_s26 = smov 64   ;;  %s374_s27 = smov 4  }
   0x6   :  { %39 = dma.hbm_to_vmem [thread:$0]  %s32_s20, 128, %s34_s22, [#allocation6], %s373_s26, %s373_s26, %s374_s27  }
   0x7   :  { %s375_s28 = smov [#allocation2]   ;;  %s44_s1 = sshll.u32 %s444_s2, 4  ;;  %s45_s1 = int_to_ptr.hbm [resolvable:$true] %s44_s1 }
   0x8   :  { %s20_s29 = sshll.u32 %s375_s28, 4  ;;  %s57_s8 = sshll.u32 %s445_s3, 4  ;;  %s21_s29 = int_to_ptr.vmem [resolvable:$true] %s20_s29  ;;  %s58_s8 = int_to_ptr.hbm [resolvable:$true] %s57_s8 }
   0x9   :  { %26 = dma.hbm_to_vmem [thread:$0]  %s19_s25, 128, %s21_s29, [#allocation3], %s373_s26, %s373_s26, %s374_s27  }
   0xa   :  { %s376_s9 = smov [#allocation7]   ;;  %s377_s11 = smov [#allocation8]  }
   0xb   :  { %s46_s10 = sshll.u32 %s376_s9, 4  ;;  %s59_s2 = sshll.u32 %s377_s11, 4  ;;  %s47_s10 = int_to_ptr.vmem [resolvable:$true] %s46_s10  ;;  %s60_s2 = int_to_ptr.vmem [resolvable:$true] %s59_s2 }
   0xc   :  { %52 = dma.hbm_to_vmem [thread:$0]  %s45_s1, 256, %s47_s10, [#allocation6], %s373_s26, %s373_s26, %s374_s27  }
   0xd   :  { %65 = dma.hbm_to_vmem [thread:$0]  %s58_s8, 256, %s60_s2, [#allocation9], %s373_s26, %s373_s26, %s374_s27  }
   0xe   :  { %364 = dma.done.wait [#allocation3], 128  }
   0xf   :  { %365 = vsyncadd [#allocation3], 4294967168 }
  0x10   :  { %366 = dma.done.wait [#allocation6], 384  }
  0x11   :  { %367 = vsyncadd [#allocation6], 4294966912 }
  0x12   :  { %368 = dma.done.wait [#allocation9], 256  }
  0x13   :  { %369 = vsyncadd [#allocation9], 4294967040  ;;  %v233_v0 = vld [vmem:[#allocation7 + $0x8] sm:$0xff]  ;;  %v236_v1 = vld [vmem:[#allocation8 + $0x8] sm:$0xff]  ;;  %vm111_vm0 = vcmask 261120   ;;  %vm181_vm1 = vcmask 519168  }
  0x14   :  { %121 = vmatpush.bf16.msra.mxu0 %v233_v0  ;;  %161 = vmatpush.bf16.msra.mxu1 %v236_v1  ;;  %v232_v2 = vld [vmem:[#allocation7] sm:$0xff]  ;;  %v235_v3 = vld [vmem:[#allocation8] sm:$0xff]  ;;  %v234_v5 = vld [vmem:[#allocation5] sm:$0xff]  ;;  %s190_s16 = sshll.u32 %s447_s5, 4  ;;  %s191_s16 = int_to_ptr.hbm [resolvable:$true] %s190_s16 }
  0x15   :  { %v231_v4 = vld [vmem:[#allocation2] sm:$0xff] }
  0x16   :  { %v91_v6 = vld [vmem:[%s446_s4] sm:$0x1]  ;;  %s378_s4 = smov [#allocation10]  }
  0x17   :  { %v92_v7 = vunpack.c.l.bf16 %v91_v6  ;;  %s188_s13 = sshll.u32 %s378_s4, 4  ;;  %s189_s13 = int_to_ptr.vmem [resolvable:$true] %s188_s13 }
  0x18   :  { %122 = vmatpush.bf16.msra.mxu0 %v232_v2  ;;  %162 = vmatpush.bf16.msra.mxu1 %v235_v3 }
  0x19   :  { %v93_v8 = vperm.slane %v92_v7, 0 }
  0x1b   :  { %217 = vmatmul.msk.bf16.vlgmr.msra.gmra.mxu0 %vm111_vm0, %v231_v4  ;;  %230 = vmatmul.msk.bf16.vlgmr.msra.gmra.mxu1 %vm111_vm0, %v234_v5 }
  0x98   :  { %v124_v9 = vpop.f32.mrf.mxu0  ;;  %v164_v10 = vpop.f32.mrf.mxu1 }
  0x99   :  { %v125_v11 = vadd.f32 %v124_v9, %v93_v8  ;;  %v171_v12 = vpack.c.bf16 %v164_v10, %v164_v10 }
  0x9b   :  { %v169_v13 = vpack.c.bf16 %v125_v11, %v125_v11  ;;  %v175_v14 = vunpack.c.l.bf16 %v171_v12 }
  0x9d   :  { %v173_v15 = vunpack.c.l.bf16 %v169_v13 }
  0x9f   :  { %v177_v16 = vadd.f32 %v175_v14, %v173_v15 }
  0xa0   :  { %v126_v17 = vpop.f32.mrf.mxu0  ;;  %v166_v18 = vpop.f32.mrf.mxu1 }
  0xa1   :  { %v179_v19 = vpack.c.bf16 %v177_v16, %v177_v16  ;;  %v127_v20 = vadd.f32 %v126_v17, %v93_v8  ;;  %v172_v21 = vpack.c.bf16 %v166_v18, %v166_v18 }
  0xa3   :  { %v170_v22 = vpack.c.bf16 %v127_v20, %v127_v20  ;;  %182 = vst.msk [vmem:[#allocation10] sm:$0xf] %vm181_vm1, %v179_v19  ;;  %v176_v24 = vunpack.c.l.bf16 %v172_v21 }
  0xa5   :  { %v174_v23 = vunpack.c.l.bf16 %v170_v22 }
  0xa7   :  { %v178_v25 = vadd.f32 %v176_v24, %v174_v23 }
  0xa9   :  { %v180_v26 = vpack.c.bf16 %v178_v25, %v178_v25 }
  0xab   :  { %183 = vst.msk [vmem:[#allocation10 + $0x4] sm:$0xf] %vm181_vm1, %v180_v26 }
  0xac   :  { %196 = dma.vmem_to_hbm [thread:$0]  %s189_s13, 128, %s191_s16, [#allocation4], %s373_s26, %s373_s26, %s374_s27  }
  0xad   :  { %370 = dma.done.wait [#allocation4], 128  }
  0xae   :  { %371 = vsyncadd [#allocation4], 4294967168 }
  0xaf   :  { %201 = vsyncpa [#allocation3], 1 }
  0xb0   :  { %202 = vsyncpa [#allocation6], 1 }
  0xb1   :  { %203 = vsyncpa [#allocation9], 1 }
  0xb2   :  { %204 = vsyncpa [#allocation4], 1 }

</bundles_post_ra>
